<compile_context>
chip_gen: v6e
topology: v6e:2x2x1
jax: 0.10.0
libtpu: 0.0.40
codegen_flags: <defaults>
</compile_context>

<pallas_src>
import functools

import jax
import jax.numpy as jnp
from jax.experimental import pallas as pl
from jax.experimental.pallas import tpu as pltpu

_LN_EPS = 1e-5
_VMEM_LIMIT = 64 << 20


# --------------------------------------------------------------------------- helpers

def _layernorm(x, gamma, beta):
    mu = jnp.mean(x, axis=-1, keepdims=True)
    xc = x - mu
    var = jnp.mean(xc * xc, axis=-1, keepdims=True)
    return xc * jax.lax.rsqrt(var + _LN_EPS) * gamma + beta


def _erf(x):
    # Abramowitz & Stegun 7.1.26 (|err| <= 1.5e-7). Uses only exp/mul/add/select so it
    # lowers cleanly on every TPU generation while keeping exact-GELU semantics.
    a1, a2, a3, a4, a5 = 0.254829592, -0.284496736, 1.421413741, -1.453152027, 1.061405429
    p = 0.3275911
    sgn = jnp.where(x >= 0.0, 1.0, -1.0)
    ax = jnp.abs(x)
    t = 1.0 / (1.0 + p * ax)
    poly = ((((a5 * t + a4) * t + a3) * t + a2) * t + a1) * t
    return sgn * (1.0 - poly * jnp.exp(-ax * ax))


def _gelu_exact(x):
    return 0.5 * x * (1.0 + _erf(x * 0.7071067811865476))


def _row_tile(total, target=512):
    """Largest divisor of `total` that is a multiple of 8 and <= target (else total)."""
    if total <= target:
        return total
    t = (target // 8) * 8
    while t >= 8:
        if total % t == 0:
            return t
        t -= 8
    return total


def _cparams(n_axes):
    return pltpu.CompilerParams(
        dimension_semantics=("parallel",) * n_axes,
        vmem_limit_bytes=_VMEM_LIMIT,
    )


# --------------------------------------------------------------------------- kernels

def ln_qkv_kernel(x_ref, g_ref, b_ref, wqkv_ref, o_ref):
    x = x_ref[...]                                           # (T_tile, D)
    ln = _layernorm(x, g_ref[...], b_ref[...])
    o_ref[...] = jnp.dot(ln, wqkv_ref[...],
                         preferred_element_type=jnp.float32).astype(o_ref.dtype)


def head_attention_kernel(q_ref, k_ref, v_ref, o_ref, *, scale):
    q = q_ref[0, 0]                                          # (N, d)
    k = k_ref[0, 0]
    v = v_ref[0, 0]
    dots = jax.lax.dot_general(q, k, (((1,), (1,)), ((), ())),
                               preferred_element_type=jnp.float32) * scale   # (N, N)
    m = jnp.max(dots, axis=-1, keepdims=True)
    e = jnp.exp(dots - m)
    attn = e / jnp.sum(e, axis=-1, keepdims=True)
    o_ref[0, 0] = jnp.dot(attn, v, preferred_element_type=jnp.float32).astype(o_ref.dtype)


def out_proj_residual_kernel(a_ref, w_ref, b_ref, x_ref, o_ref):
    out = jnp.dot(a_ref[...], w_ref[...], preferred_element_type=jnp.float32) + b_ref[...]
    o_ref[...] = (x_ref[...] + out).astype(o_ref.dtype)


def ffn_block_kernel(x_ref, g_ref, b_ref, w1_ref, b1_ref, w2_ref, b2_ref, o_ref):
    x = x_ref[...]                                           # (T_tile, D)
    ln = _layernorm(x, g_ref[...], b_ref[...])
    h = jnp.dot(ln, w1_ref[...], preferred_element_type=jnp.float32) + b1_ref[...]
    h = _gelu_exact(h)
    out = jnp.dot(h, w2_ref[...], preferred_element_type=jnp.float32) + b2_ref[...]
    o_ref[...] = (x + out).astype(o_ref.dtype)


# --------------------------------------------------------------------------- wrappers

def attention_block(x, p, heads):
    B, N, D = x.shape
    d = D // heads
    scale = float(D) ** -0.5
    T = B * N
    x_flat = x.reshape(T, D)
    tile = _row_tile(T)
    grid = (T // tile,)
    isz = x.dtype.itemsize

    qkv_flat = pl.pallas_call(
        ln_qkv_kernel,
        out_shape=jax.ShapeDtypeStruct((T, 3 * D), x.dtype),
        grid_spec=pltpu.PrefetchScalarGridSpec(
            num_scalar_prefetch=0,
            grid=grid,
            in_specs=[
                pl.BlockSpec((tile, D), lambda i: (i, 0)),
                pl.BlockSpec((1, D), lambda i: (0, 0)),
                pl.BlockSpec((1, D), lambda i: (0, 0)),
                pl.BlockSpec((D, 3 * D), lambda i: (0, 0)),
            ],
            out_specs=pl.BlockSpec((tile, 3 * D), lambda i: (i, 0)),
        ),
        compiler_params=_cparams(1),
        cost_estimate=pl.CostEstimate(
            flops=int(2 * T * D * 3 * D),
            transcendentals=int(T),
            bytes_accessed=int((T * D + 3 * D * D + T * 3 * D) * isz),
        ),
    )(x_flat, p["ln_g"], p["ln_b"], p["w_qkv_t"])

    # Head split (layout plumbing, done in XLA): (T, 3D) -> q/k/v each (B, H, N, d)
    qkv = qkv_flat.reshape(B, N, 3 * D)
    q, k, v = jnp.split(qkv, 3, axis=-1)

    def split_heads(t):
        return t.reshape(B, N, heads, d).transpose(0, 2, 1, 3)

    q, k, v = split_heads(q), split_heads(k), split_heads(v)

    attn_out = pl.pallas_call(
        functools.partial(head_attention_kernel, scale=scale),
        out_shape=jax.ShapeDtypeStruct((B, heads, N, d), x.dtype),
        grid_spec=pltpu.PrefetchScalarGridSpec(
            num_scalar_prefetch=0,
            grid=(B, heads),
            in_specs=[pl.BlockSpec((1, 1, N, d), lambda b, h: (b, h, 0, 0))] * 3,
            out_specs=pl.BlockSpec((1, 1, N, d), lambda b, h: (b, h, 0, 0)),
        ),
        compiler_params=_cparams(2),
        cost_estimate=pl.CostEstimate(
            flops=int(4 * B * heads * N * N * d),
            transcendentals=int(B * heads * N * N),
            bytes_accessed=int(4 * B * heads * N * d * isz),
        ),
    )(q, k, v)

    merged = attn_out.transpose(0, 2, 1, 3).reshape(T, D)

    out = pl.pallas_call(
        out_proj_residual_kernel,
        out_shape=jax.ShapeDtypeStruct((T, D), x.dtype),
        grid_spec=pltpu.PrefetchScalarGridSpec(
            num_scalar_prefetch=0,
            grid=grid,
            in_specs=[
                pl.BlockSpec((tile, D), lambda i: (i, 0)),
                pl.BlockSpec((D, D), lambda i: (0, 0)),
                pl.BlockSpec((1, D), lambda i: (0, 0)),
                pl.BlockSpec((tile, D), lambda i: (i, 0)),
            ],
            out_specs=pl.BlockSpec((tile, D), lambda i: (i, 0)),
        ),
        compiler_params=_cparams(1),
        cost_estimate=pl.CostEstimate(
            flops=int(2 * T * D * D),
            transcendentals=0,
            bytes_accessed=int((3 * T * D + D * D) * isz),
        ),
        input_output_aliases={3: 0},   # residual input x is elementwise-consumed -> reuse its buffer
    )(merged, p["w_out_t"], p["b_out"], x_flat)
    return out.reshape(B, N, D)


def ffn_block(x, p):
    B, N, D = x.shape
    M = p["w1_t"].shape[1]
    T = B * N
    x_flat = x.reshape(T, D)
    tile = _row_tile(T)
    grid = (T // tile,)
    isz = x.dtype.itemsize

    out = pl.pallas_call(
        ffn_block_kernel,
        out_shape=jax.ShapeDtypeStruct((T, D), x.dtype),
        grid_spec=pltpu.PrefetchScalarGridSpec(
            num_scalar_prefetch=0,
            grid=grid,
            in_specs=[
                pl.BlockSpec((tile, D), lambda i: (i, 0)),
                pl.BlockSpec((1, D), lambda i: (0, 0)),
                pl.BlockSpec((1, D), lambda i: (0, 0)),
                pl.BlockSpec((D, M), lambda i: (0, 0)),
                pl.BlockSpec((1, M), lambda i: (0, 0)),
                pl.BlockSpec((M, D), lambda i: (0, 0)),
                pl.BlockSpec((1, D), lambda i: (0, 0)),
            ],
            out_specs=pl.BlockSpec((tile, D), lambda i: (i, 0)),
        ),
        compiler_params=_cparams(1),
        cost_estimate=pl.CostEstimate(
            flops=int(4 * T * D * M),
            transcendentals=int(2 * T * M + T),
            bytes_accessed=int((2 * T * D + 2 * D * M) * isz),
        ),
        input_output_aliases={0: 0},   # x only needed inside the kernel (residual is fused)
    )(x_flat, p["ln_g"], p["ln_b"], p["w1_t"], p["b1"], p["w2_t"], p["b2"])
    return out.reshape(B, N, D)


@functools.partial(jax.jit, static_argnames=("heads",))
def transformer_forward(x, params, *, heads):
    for lp in params:
        x = attention_block(x, lp["attn"], heads)
        x = ffn_block(x, lp["ffn"])
    return x


# --------------------------------------------------------------------------- demo / check

if __name__ == "__main__":
    B, N = 2, 8            # batch, sequence length
    dim, heads = 32, 4     # model dim, heads (head_dim = 8)
    mlp_dim, depth = 64, 2
    # dropout = 0.0 -> identity (see TODO at top)

    key = jax.random.PRNGKey(0)

    def init_layer(k):
        ks = jax.random.split(k, 11)
        s = 0.1
        attn = dict(
            ln_g=1.0 + s * jax.random.normal(ks[0], (dim,), jnp.float32),
            ln_b=s * jax.random.normal(ks[1], (dim,), jnp.float32),
            w_qkv=s * jax.random.normal(ks[2], (3 * dim, dim), jnp.float32),  # torch (out, in)
            w_out=s * jax.random.normal(ks[3], (dim, dim), jnp.float32),
            b_out=s * jax.random.normal(ks[4], (dim,), jnp.float32),
        )
        ffn = dict(
            ln_g=1.0 + s * jax.random.normal(ks[5], (dim,), jnp.float32),
            ln_b=s * jax.random.normal(ks[6], (dim,), jnp.float32),
            w1=s * jax.random.normal(ks[7], (mlp_dim, dim), jnp.float32),
            b1=s * jax.random.normal(ks[8], (mlp_dim,), jnp.float32),
            w2=s * jax.random.normal(ks[9], (dim, mlp_dim), jnp.float32),
            b2=s * jax.random.normal(ks[10], (dim,), jnp.float32),
        )
        return dict(attn=attn, ffn=ffn)

    def to_kernel_params(lp):
        a, f = lp["attn"], lp["ffn"]
        return dict(
            attn=dict(
                ln_g=a["ln_g"].reshape(1, dim),
                ln_b=a["ln_b"].reshape(1, dim),
                w_qkv_t=a["w_qkv"].T,            # (dim, 3*dim)
                w_out_t=a["w_out"].T,            # (dim, dim)
                b_out=a["b_out"].reshape(1, dim),
            ),
            ffn=dict(
                ln_g=f["ln_g"].reshape(1, dim),
                ln_b=f["ln_b"].reshape(1, dim),
                w1_t=f["w1"].T,                  # (dim, mlp_dim)
                b1=f["b1"].reshape(1, mlp_dim),
                w2_t=f["w2"].T,                  # (mlp_dim, dim)
                b2=f["b2"].reshape(1, dim),
            ),
        )

    layer_keys = jax.random.split(jax.random.fold_in(key, 1), depth)
    torch_params = tuple(init_layer(k) for k in layer_keys)
    kernel_params = tuple(to_kernel_params(lp) for lp in torch_params)

    x = jax.random.normal(jax.random.fold_in(key, 2), (B, N, dim), jnp.float32)

    out = transformer_forward(x, kernel_params, heads=heads)
    out = jax.block_until_ready(out)

    # Pure-JAX reference mirroring the PyTorch module (eval mode, mask=None).
    def ref_layernorm(t, g, b):
        mu = t.mean(-1, keepdims=True)
        var = ((t - mu) ** 2).mean(-1, keepdims=True)
        return (t - mu) / jnp.sqrt(var + _LN_EPS) * g + b

    def ref_forward(t, params):
        d = dim // heads
        for lp in params:
            a, f = lp["attn"], lp["ffn"]
            ln = ref_layernorm(t, a["ln_g"], a["ln_b"])
            qkv = ln @ a["w_qkv"].T
            q, k, v = jnp.split(qkv, 3, axis=-1)
            sh = lambda z: z.reshape(B, N, heads, d).transpose(0, 2, 1, 3)
            q, k, v = sh(q), sh(k), sh(v)
            dots = jnp.einsum("bhid,bhjd->bhij", q, k) * (dim ** -0.5)
            attn = jax.nn.softmax(dots, axis=-1)
            o = jnp.einsum("bhij,bhjd->bhid", attn, v)
            o = o.transpose(0, 2, 1, 3).reshape(B, N, dim)
            t = t + o @ a["w_out"].T + a["b_out"]
            ln2 = ref_layernorm(t, f["ln_g"], f["ln_b"])
            h = jax.nn.gelu(ln2 @ f["w1"].T + f["b1"], approximate=False)
            t = t + h @ f["w2"].T + f["b2"]
        return t

    ref = ref_forward(x, torch_params)
    assert jnp.allclose(out, ref, atol=1e-4, rtol=1e-4), (
        f"mismatch vs reference: max abs err {jnp.max(jnp.abs(out - ref))}")

    print("KERNEL_OK")
</pallas_src>

<mosaic_0001>
module attributes {stable_mosaic.version = 11 : i64} {
  func.func @ln_qkv_kernel(%arg0: i32, %arg1: memref<16x32xf32, #tpu.memory_space<vmem>>, %arg2: memref<1x32xf32, #tpu.memory_space<vmem>>, %arg3: memref<1x32xf32, #tpu.memory_space<vmem>>, %arg4: memref<32x96xf32, #tpu.memory_space<vmem>>, %arg5: memref<16x96xf32, #tpu.memory_space<vmem>>) attributes {dimension_semantics = [#tpu.dimension_semantics<parallel>], iteration_bounds = array<i64: 1>, scalar_prefetch = 0 : i64, scratch_operands = 0 : i64, tpu.core_type = #tpu.core_type<tc>, window_params = [{transform_indices = @transform_0, window_bounds = array<i64: 16, 32>}, {pipeline_mode = #tpu.pipeline_mode<synchronous>, transform_indices = @transform_1, window_bounds = array<i64: 1, 32>}, {pipeline_mode = #tpu.pipeline_mode<synchronous>, transform_indices = @transform_2, window_bounds = array<i64: 1, 32>}, {pipeline_mode = #tpu.pipeline_mode<synchronous>, transform_indices = @transform_3, window_bounds = array<i64: 32, 96>}, {transform_indices = @transform_4, window_bounds = array<i64: 16, 96>}]} {
    %c0 = arith.constant 0 : index
    %c0_0 = arith.constant 0 : index
    %0 = vector.load %arg1[%c0, %c0_0] : memref<16x32xf32, #tpu.memory_space<vmem>>, vector<16x32xf32>
    %c0_1 = arith.constant 0 : index
    %c0_2 = arith.constant 0 : index
    %1 = vector.load %arg2[%c0_1, %c0_2] : memref<1x32xf32, #tpu.memory_space<vmem>>, vector<1x32xf32>
    %c0_3 = arith.constant 0 : index
    %c0_4 = arith.constant 0 : index
    %2 = vector.load %arg3[%c0_3, %c0_4] : memref<1x32xf32, #tpu.memory_space<vmem>>, vector<1x32xf32>
    %cst = arith.constant dense<0.000000e+00> : vector<16xf32>
    %3 = vector.multi_reduction <add>, %0, %cst [1] : vector<16x32xf32> to vector<16xf32>
    %4 = vector.shape_cast %3 : vector<16xf32> to vector<16x1xf32>
    %cst_5 = arith.constant 3.200000e+01 : f32
    %5 = vector.broadcast %cst_5 : f32 to vector<16x1xf32>
    %6 = arith.divf %4, %5 : vector<16x1xf32>
    %7 = vector.broadcast %6 : vector<16x1xf32> to vector<16x32xf32>
    %8 = arith.subf %0, %7 : vector<16x32xf32>
    %9 = arith.mulf %8, %8 : vector<16x32xf32>
    %cst_6 = arith.constant dense<0.000000e+00> : vector<16xf32>
    %10 = vector.multi_reduction <add>, %9, %cst_6 [1] : vector<16x32xf32> to vector<16xf32>
    %11 = vector.shape_cast %10 : vector<16xf32> to vector<16x1xf32>
    %cst_7 = arith.constant 3.200000e+01 : f32
    %12 = vector.broadcast %cst_7 : f32 to vector<16x1xf32>
    %13 = arith.divf %11, %12 : vector<16x1xf32>
    %cst_8 = arith.constant 9.99999974E-6 : f32
    %14 = vector.broadcast %cst_8 : f32 to vector<16x1xf32>
    %15 = arith.addf %13, %14 : vector<16x1xf32>
    %16 = math.rsqrt %15 : vector<16x1xf32>
    %17 = vector.broadcast %16 : vector<16x1xf32> to vector<16x32xf32>
    %18 = arith.mulf %8, %17 : vector<16x32xf32>
    %19 = vector.broadcast %1 : vector<1x32xf32> to vector<16x32xf32>
    %20 = arith.mulf %18, %19 : vector<16x32xf32>
    %21 = vector.broadcast %2 : vector<1x32xf32> to vector<16x32xf32>
    %22 = arith.addf %20, %21 : vector<16x32xf32>
    %c0_9 = arith.constant 0 : index
    %c0_10 = arith.constant 0 : index
    %23 = vector.load %arg4[%c0_9, %c0_10] : memref<32x96xf32, #tpu.memory_space<vmem>>, vector<32x96xf32>
    %cst_11 = arith.constant dense<0.000000e+00> : vector<16x96xf32>
    %24 = tpu.matmul %22, %23, %cst_11 {dimension_numbers = #tpu.dot_dimension_numbers<[1], [0], [0], [1], [0, 0, 1, 1], [], []>} : vector<16x32xf32>, vector<32x96xf32>, vector<16x96xf32> -> vector<16x96xf32>
    %c0_12 = arith.constant 0 : index
    %c0_13 = arith.constant 0 : index
    %25 = vector.load %arg5[%c0_12, %c0_13] : memref<16x96xf32, #tpu.memory_space<vmem>>, vector<16x96xf32>
    tpu.vector_store %arg5[%c0_12, %c0_13], %24 {strides = array<i32>} : memref<16x96xf32, #tpu.memory_space<vmem>>, vector<16x96xf32>,
    return
  }
  func.func @transform_0(%arg0: i32) -> (i32, i32) {
    %c0_i32 = arith.constant 0 : i32
    %c0_i32_0 = arith.constant 0 : i32
    return %arg0, %c0_i32 : i32, i32
  }
  func.func @transform_1(%arg0: i32) -> (i32, i32) {
    %c0_i32 = arith.constant 0 : i32
    %c0_i32_0 = arith.constant 0 : i32
    %c0_i32_1 = arith.constant 0 : i32
    return %c0_i32, %c0_i32_0 : i32, i32
  }
  func.func @transform_2(%arg0: i32) -> (i32, i32) {
    %c0_i32 = arith.constant 0 : i32
    %c0_i32_0 = arith.constant 0 : i32
    %c0_i32_1 = arith.constant 0 : i32
    return %c0_i32, %c0_i32_0 : i32, i32
  }
  func.func @transform_3(%arg0: i32) -> (i32, i32) {
    %c0_i32 = arith.constant 0 : i32
    %c0_i32_0 = arith.constant 0 : i32
    %c0_i32_1 = arith.constant 0 : i32
    return %c0_i32, %c0_i32_0 : i32, i32
  }
  func.func @transform_4(%arg0: i32) -> (i32, i32) {
    %c0_i32 = arith.constant 0 : i32
    %c0_i32_0 = arith.constant 0 : i32
    return %arg0, %c0_i32 : i32, i32
  }
}

module attributes {stable_mosaic.version = 11 : i64} {
  func.func @head_attention_kernel(%arg0: i32, %arg1: i32, %arg2: memref<1x1x8x8xf32, #tpu.memory_space<vmem>>, %arg3: memref<1x1x8x8xf32, #tpu.memory_space<vmem>>, %arg4: memref<1x1x8x8xf32, #tpu.memory_space<vmem>>, %arg5: memref<1x1x8x8xf32, #tpu.memory_space<vmem>>) attributes {dimension_semantics = [#tpu.dimension_semantics<parallel>, #tpu.dimension_semantics<parallel>], iteration_bounds = array<i64: 2, 4>, scalar_prefetch = 0 : i64, scratch_operands = 0 : i64, tpu.core_type = #tpu.core_type<tc>, window_params = [{transform_indices = @transform_0, window_bounds = array<i64: 1, 1, 8, 8>}, {transform_indices = @transform_1, window_bounds = array<i64: 1, 1, 8, 8>}, {transform_indices = @transform_2, window_bounds = array<i64: 1, 1, 8, 8>}, {transform_indices = @transform_3, window_bounds = array<i64: 1, 1, 8, 8>}]} {
    %c0 = arith.constant 0 : index
    %c0_0 = arith.constant 0 : index
    %c0_1 = arith.constant 0 : index
    %c0_2 = arith.constant 0 : index
    %0 = vector.load %arg2[%c0, %c0_0, %c0_1, %c0_2] : memref<1x1x8x8xf32, #tpu.memory_space<vmem>>, vector<1x1x8x8xf32>
    %1 = vector.shape_cast %0 : vector<1x1x8x8xf32> to vector<8x8xf32>
    %c0_3 = arith.constant 0 : index
    %c0_4 = arith.constant 0 : index
    %c0_5 = arith.constant 0 : index
    %c0_6 = arith.constant 0 : index
    %2 = vector.load %arg3[%c0_3, %c0_4, %c0_5, %c0_6] : memref<1x1x8x8xf32, #tpu.memory_space<vmem>>, vector<1x1x8x8xf32>
    %3 = vector.shape_cast %2 : vector<1x1x8x8xf32> to vector<8x8xf32>
    %c0_7 = arith.constant 0 : index
    %c0_8 = arith.constant 0 : index
    %c0_9 = arith.constant 0 : index
    %c0_10 = arith.constant 0 : index
    %4 = vector.load %arg4[%c0_7, %c0_8, %c0_9, %c0_10] : memref<1x1x8x8xf32, #tpu.memory_space<vmem>>, vector<1x1x8x8xf32>
    %5 = vector.shape_cast %4 : vector<1x1x8x8xf32> to vector<8x8xf32>
    %cst = arith.constant dense<0.000000e+00> : vector<8x8xf32>
    %6 = tpu.matmul %1, %3, %cst {dimension_numbers = #tpu.dot_dimension_numbers<[1], [1], [0], [0], [0, 0, 1, 0], [], []>} : vector<8x8xf32>, vector<8x8xf32>, vector<8x8xf32> -> vector<8x8xf32>
    %cst_11 = arith.constant 0.176776692 : f32
    %7 = vector.broadcast %cst_11 : f32 to vector<8x8xf32>
    %8 = arith.mulf %6, %7 : vector<8x8xf32>
    %cst_12 = arith.constant dense<0xFF800000> : vector<8xf32>
    %9 = vector.multi_reduction <maximumf>, %8, %cst_12 [1] : vector<8x8xf32> to vector<8xf32>
    %10 = vector.shape_cast %9 : vector<8xf32> to vector<8x1xf32>
    %11 = vector.broadcast %10 : vector<8x1xf32> to vector<8x8xf32>
    %12 = arith.subf %8, %11 : vector<8x8xf32>
    %13 = math.exp %12 : vector<8x8xf32>
    %cst_13 = arith.constant dense<0.000000e+00> : vector<8xf32>
    %14 = vector.multi_reduction <add>, %13, %cst_13 [1] : vector<8x8xf32> to vector<8xf32>
    %15 = vector.shape_cast %14 : vector<8xf32> to vector<8x1xf32>
    %16 = vector.broadcast %15 : vector<8x1xf32> to vector<8x8xf32>
    %17 = arith.divf %13, %16 : vector<8x8xf32>
    %cst_14 = arith.constant dense<0.000000e+00> : vector<8x8xf32>
    %18 = tpu.matmul %17, %5, %cst_14 {dimension_numbers = #tpu.dot_dimension_numbers<[1], [0], [0], [1], [0, 0, 1, 1], [], []>} : vector<8x8xf32>, vector<8x8xf32>, vector<8x8xf32> -> vector<8x8xf32>
    %c0_15 = arith.constant 0 : index
    %c0_16 = arith.constant 0 : index
    %c0_17 = arith.constant 0 : index
    %c0_18 = arith.constant 0 : index
    %19 = vector.load %arg5[%c0_15, %c0_16, %c0_17, %c0_18] : memref<1x1x8x8xf32, #tpu.memory_space<vmem>>, vector<1x1x8x8xf32>
    %20 = vector.shape_cast %19 : vector<1x1x8x8xf32> to vector<8x8xf32>
    %21 = vector.shape_cast %18 : vector<8x8xf32> to vector<1x1x8x8xf32>
    tpu.vector_store %arg5[%c0_15, %c0_16, %c0_17, %c0_18], %21 {strides = array<i32>} : memref<1x1x8x8xf32, #tpu.memory_space<vmem>>, vector<1x1x8x8xf32>,
    return
  }
  func.func @transform_0(%arg0: i32, %arg1: i32) -> (i32, i32, i32, i32) {
    %c0_i32 = arith.constant 0 : i32
    %c0_i32_0 = arith.constant 0 : i32
    %c0_i32_1 = arith.constant 0 : i32
    return %arg0, %arg1, %c0_i32, %c0_i32_0 : i32, i32, i32, i32
  }
  func.func @transform_1(%arg0: i32, %arg1: i32) -> (i32, i32, i32, i32) {
    %c0_i32 = arith.constant 0 : i32
    %c0_i32_0 = arith.constant 0 : i32
    %c0_i32_1 = arith.constant 0 : i32
    return %arg0, %arg1, %c0_i32, %c0_i32_0 : i32, i32, i32, i32
  }
  func.func @transform_2(%arg0: i32, %arg1: i32) -> (i32, i32, i32, i32) {
    %c0_i32 = arith.constant 0 : i32
    %c0_i32_0 = arith.constant 0 : i32
    %c0_i32_1 = arith.constant 0 : i32
    return %arg0, %arg1, %c0_i32, %c0_i32_0 : i32, i32, i32, i32
  }
  func.func @transform_3(%arg0: i32, %arg1: i32) -> (i32, i32, i32, i32) {
    %c0_i32 = arith.constant 0 : i32
    %c0_i32_0 = arith.constant 0 : i32
    %c0_i32_1 = arith.constant 0 : i32
    return %arg0, %arg1, %c0_i32, %c0_i32_0 : i32, i32, i32, i32
  }
}

module attributes {stable_mosaic.version = 11 : i64} {
  func.func @out_proj_residual_kernel(%arg0: i32, %arg1: memref<16x32xf32, #tpu.memory_space<vmem>>, %arg2: memref<32x32xf32, #tpu.memory_space<vmem>>, %arg3: memref<1x32xf32, #tpu.memory_space<vmem>>, %arg4: memref<16x32xf32, #tpu.memory_space<vmem>>, %arg5: memref<16x32xf32, #tpu.memory_space<vmem>>) attributes {dimension_semantics = [#tpu.dimension_semantics<parallel>], iteration_bounds = array<i64: 1>, scalar_prefetch = 0 : i64, scratch_operands = 0 : i64, tpu.core_type = #tpu.core_type<tc>, window_params = [{transform_indices = @transform_0, window_bounds = array<i64: 16, 32>}, {pipeline_mode = #tpu.pipeline_mode<synchronous>, transform_indices = @transform_1, window_bounds = array<i64: 32, 32>}, {pipeline_mode = #tpu.pipeline_mode<synchronous>, transform_indices = @transform_2, window_bounds = array<i64: 1, 32>}, {transform_indices = @transform_3, window_bounds = array<i64: 16, 32>}, {transform_indices = @transform_4, window_bounds = array<i64: 16, 32>}]} {
    %c0 = arith.constant 0 : index
    %c0_0 = arith.constant 0 : index
    %0 = vector.load %arg1[%c0, %c0_0] : memref<16x32xf32, #tpu.memory_space<vmem>>, vector<16x32xf32>
    %c0_1 = arith.constant 0 : index
    %c0_2 = arith.constant 0 : index
    %1 = vector.load %arg2[%c0_1, %c0_2] : memref<32x32xf32, #tpu.memory_space<vmem>>, vector<32x32xf32>
    %cst = arith.constant dense<0.000000e+00> : vector<16x32xf32>
    %2 = tpu.matmul %0, %1, %cst {dimension_numbers = #tpu.dot_dimension_numbers<[1], [0], [0], [1], [0, 0, 1, 1], [], []>} : vector<16x32xf32>, vector<32x32xf32>, vector<16x32xf32> -> vector<16x32xf32>
    %c0_3 = arith.constant 0 : index
    %c0_4 = arith.constant 0 : index
    %3 = vector.load %arg3[%c0_3, %c0_4] : memref<1x32xf32, #tpu.memory_space<vmem>>, vector<1x32xf32>
    %4 = vector.broadcast %3 : vector<1x32xf32> to vector<16x32xf32>
    %5 = arith.addf %2, %4 : vector<16x32xf32>
    %c0_5 = arith.constant 0 : index
    %c0_6 = arith.constant 0 : index
    %6 = vector.load %arg4[%c0_5, %c0_6] : memref<16x32xf32, #tpu.memory_space<vmem>>, vector<16x32xf32>
    %7 = arith.addf %6, %5 : vector<16x32xf32>
    %c0_7 = arith.constant 0 : index
    %c0_8 = arith.constant 0 : index
    %8 = vector.load %arg5[%c0_7, %c0_8] : memref<16x32xf32, #tpu.memory_space<vmem>>, vector<16x32xf32>
    tpu.vector_store %arg5[%c0_7, %c0_8], %7 {strides = array<i32>} : memref<16x32xf32, #tpu.memory_space<vmem>>, vector<16x32xf32>,
    return
  }
  func.func @transform_0(%arg0: i32) -> (i32, i32) {
    %c0_i32 = arith.constant 0 : i32
    %c0_i32_0 = arith.constant 0 : i32
    return %arg0, %c0_i32 : i32, i32
  }
  func.func @transform_1(%arg0: i32) -> (i32, i32) {
    %c0_i32 = arith.constant 0 : i32
    %c0_i32_0 = arith.constant 0 : i32
    %c0_i32_1 = arith.constant 0 : i32
    return %c0_i32, %c0_i32_0 : i32, i32
  }
  func.func @transform_2(%arg0: i32) -> (i32, i32) {
    %c0_i32 = arith.constant 0 : i32
    %c0_i32_0 = arith.constant 0 : i32
    %c0_i32_1 = arith.constant 0 : i32
    return %c0_i32, %c0_i32_0 : i32, i32
  }
  func.func @transform_3(%arg0: i32) -> (i32, i32) {
    %c0_i32 = arith.constant 0 : i32
    %c0_i32_0 = arith.constant 0 : i32
    return %arg0, %c0_i32 : i32, i32
  }
  func.func @transform_4(%arg0: i32) -> (i32, i32) {
    %c0_i32 = arith.constant 0 : i32
    %c0_i32_0 = arith.constant 0 : i32
    return %arg0, %c0_i32 : i32, i32
  }
}

module attributes {stable_mosaic.version = 11 : i64} {
  func.func @ffn_block_kernel(%arg0: i32, %arg1: memref<16x32xf32, #tpu.memory_space<vmem>>, %arg2: memref<1x32xf32, #tpu.memory_space<vmem>>, %arg3: memref<1x32xf32, #tpu.memory_space<vmem>>, %arg4: memref<32x64xf32, #tpu.memory_space<vmem>>, %arg5: memref<1x64xf32, #tpu.memory_space<vmem>>, %arg6: memref<64x32xf32, #tpu.memory_space<vmem>>, %arg7: memref<1x32xf32, #tpu.memory_space<vmem>>, %arg8: memref<16x32xf32, #tpu.memory_space<vmem>>) attributes {dimension_semantics = [#tpu.dimension_semantics<parallel>], iteration_bounds = array<i64: 1>, scalar_prefetch = 0 : i64, scratch_operands = 0 : i64, tpu.core_type = #tpu.core_type<tc>, window_params = [{transform_indices = @transform_0, window_bounds = array<i64: 16, 32>}, {pipeline_mode = #tpu.pipeline_mode<synchronous>, transform_indices = @transform_1, window_bounds = array<i64: 1, 32>}, {pipeline_mode = #tpu.pipeline_mode<synchronous>, transform_indices = @transform_2, window_bounds = array<i64: 1, 32>}, {pipeline_mode = #tpu.pipeline_mode<synchronous>, transform_indices = @transform_3, window_bounds = array<i64: 32, 64>}, {pipeline_mode = #tpu.pipeline_mode<synchronous>, transform_indices = @transform_4, window_bounds = array<i64: 1, 64>}, {pipeline_mode = #tpu.pipeline_mode<synchronous>, transform_indices = @transform_5, window_bounds = array<i64: 64, 32>}, {pipeline_mode = #tpu.pipeline_mode<synchronous>, transform_indices = @transform_6, window_bounds = array<i64: 1, 32>}, {transform_indices = @transform_7, window_bounds = array<i64: 16, 32>}]} {
    %c0 = arith.constant 0 : index
    %c0_0 = arith.constant 0 : index
    %0 = vector.load %arg1[%c0, %c0_0] : memref<16x32xf32, #tpu.memory_space<vmem>>, vector<16x32xf32>
    %c0_1 = arith.constant 0 : index
    %c0_2 = arith.constant 0 : index
    %1 = vector.load %arg2[%c0_1, %c0_2] : memref<1x32xf32, #tpu.memory_space<vmem>>, vector<1x32xf32>
    %c0_3 = arith.constant 0 : index
    %c0_4 = arith.constant 0 : index
    %2 = vector.load %arg3[%c0_3, %c0_4] : memref<1x32xf32, #tpu.memory_space<vmem>>, vector<1x32xf32>
    %cst = arith.constant dense<0.000000e+00> : vector<16xf32>
    %3 = vector.multi_reduction <add>, %0, %cst [1] : vector<16x32xf32> to vector<16xf32>
    %4 = vector.shape_cast %3 : vector<16xf32> to vector<16x1xf32>
    %cst_5 = arith.constant 3.200000e+01 : f32
    %5 = vector.broadcast %cst_5 : f32 to vector<16x1xf32>
    %6 = arith.divf %4, %5 : vector<16x1xf32>
    %7 = vector.broadcast %6 : vector<16x1xf32> to vector<16x32xf32>
    %8 = arith.subf %0, %7 : vector<16x32xf32>
    %9 = arith.mulf %8, %8 : vector<16x32xf32>
    %cst_6 = arith.constant dense<0.000000e+00> : vector<16xf32>
    %10 = vector.multi_reduction <add>, %9, %cst_6 [1] : vector<16x32xf32> to vector<16xf32>
    %11 = vector.shape_cast %10 : vector<16xf32> to vector<16x1xf32>
    %cst_7 = arith.constant 3.200000e+01 : f32
    %12 = vector.broadcast %cst_7 : f32 to vector<16x1xf32>
    %13 = arith.divf %11, %12 : vector<16x1xf32>
    %cst_8 = arith.constant 9.99999974E-6 : f32
    %14 = vector.broadcast %cst_8 : f32 to vector<16x1xf32>
    %15 = arith.addf %13, %14 : vector<16x1xf32>
    %16 = math.rsqrt %15 : vector<16x1xf32>
    %17 = vector.broadcast %16 : vector<16x1xf32> to vector<16x32xf32>
    %18 = arith.mulf %8, %17 : vector<16x32xf32>
    %19 = vector.broadcast %1 : vector<1x32xf32> to vector<16x32xf32>
    %20 = arith.mulf %18, %19 : vector<16x32xf32>
    %21 = vector.broadcast %2 : vector<1x32xf32> to vector<16x32xf32>
    %22 = arith.addf %20, %21 : vector<16x32xf32>
    %c0_9 = arith.constant 0 : index
    %c0_10 = arith.constant 0 : index
    %23 = vector.load %arg4[%c0_9, %c0_10] : memref<32x64xf32, #tpu.memory_space<vmem>>, vector<32x64xf32>
    %cst_11 = arith.constant dense<0.000000e+00> : vector<16x64xf32>
    %24 = tpu.matmul %22, %23, %cst_11 {dimension_numbers = #tpu.dot_dimension_numbers<[1], [0], [0], [1], [0, 0, 1, 1], [], []>} : vector<16x32xf32>, vector<32x64xf32>, vector<16x64xf32> -> vector<16x64xf32>
    %c0_12 = arith.constant 0 : index
    %c0_13 = arith.constant 0 : index
    %25 = vector.load %arg5[%c0_12, %c0_13] : memref<1x64xf32, #tpu.memory_space<vmem>>, vector<1x64xf32>
    %26 = vector.broadcast %25 : vector<1x64xf32> to vector<16x64xf32>
    %27 = arith.addf %24, %26 : vector<16x64xf32>
    %cst_14 = arith.constant 5.000000e-01 : f32
    %28 = vector.broadcast %cst_14 : f32 to vector<16x64xf32>
    %29 = arith.mulf %28, %27 : vector<16x64xf32>
    %cst_15 = arith.constant 0.707106769 : f32
    %30 = vector.broadcast %cst_15 : f32 to vector<16x64xf32>
    %31 = arith.mulf %27, %30 : vector<16x64xf32>
    %cst_16 = arith.constant 0.000000e+00 : f32
    %32 = vector.broadcast %cst_16 : f32 to vector<16x64xf32>
    %33 = arith.cmpf oge, %31, %32 : vector<16x64xf32>
    %cst_17 = arith.constant 1.000000e+00 : f32
    %cst_18 = arith.constant -1.000000e+00 : f32
    %34 = vector.broadcast %cst_17 : f32 to vector<16x64xf32>
    %35 = vector.broadcast %cst_18 : f32 to vector<16x64xf32>
    %36 = arith.select %33, %34, %35 : vector<16x64xi1>, vector<16x64xf32>
    %37 = math.absf %31 : vector<16x64xf32>
    %cst_19 = arith.constant 0.327591091 : f32
    %38 = vector.broadcast %cst_19 : f32 to vector<16x64xf32>
    %39 = arith.mulf %38, %37 : vector<16x64xf32>
    %cst_20 = arith.constant 1.000000e+00 : f32
    %40 = vector.broadcast %cst_20 : f32 to vector<16x64xf32>
    %41 = arith.addf %40, %39 : vector<16x64xf32>
    %cst_21 = arith.constant 1.000000e+00 : f32
    %42 = vector.broadcast %cst_21 : f32 to vector<16x64xf32>
    %43 = arith.divf %42, %41 : vector<16x64xf32>
    %cst_22 = arith.constant 1.06140542 : f32
    %44 = vector.broadcast %cst_22 : f32 to vector<16x64xf32>
    %45 = arith.mulf %44, %43 : vector<16x64xf32>
    %cst_23 = arith.constant -1.45315206 : f32
    %46 = vector.broadcast %cst_23 : f32 to vector<16x64xf32>
    %47 = arith.addf %45, %46 : vector<16x64xf32>
    %48 = arith.mulf %47, %43 : vector<16x64xf32>
    %cst_24 = arith.constant 1.42141378 : f32
    %49 = vector.broadcast %cst_24 : f32 to vector<16x64xf32>
    %50 = arith.addf %48, %49 : vector<16x64xf32>
    %51 = arith.mulf %50, %43 : vector<16x64xf32>
    %cst_25 = arith.constant -0.284496725 : f32
    %52 = vector.broadcast %cst_25 : f32 to vector<16x64xf32>
    %53 = arith.addf %51, %52 : vector<16x64xf32>
    %54 = arith.mulf %53, %43 : vector<16x64xf32>
    %cst_26 = arith.constant 0.254829586 : f32
    %55 = vector.broadcast %cst_26 : f32 to vector<16x64xf32>
    %56 = arith.addf %54, %55 : vector<16x64xf32>
    %57 = arith.mulf %56, %43 : vector<16x64xf32>
    %cst_27 = arith.constant 0.000000e+00 : f32
    %58 = vector.broadcast %cst_27 : f32 to vector<16x64xf32>
    %59 = arith.subf %58, %37 : vector<16x64xf32>
    %60 = arith.mulf %59, %37 : vector<16x64xf32>
    %61 = math.exp %60 : vector<16x64xf32>
    %62 = arith.mulf %57, %61 : vector<16x64xf32>
    %cst_28 = arith.constant 1.000000e+00 : f32
    %63 = vector.broadcast %cst_28 : f32 to vector<16x64xf32>
    %64 = arith.subf %63, %62 : vector<16x64xf32>
    %65 = arith.mulf %36, %64 : vector<16x64xf32>
    %cst_29 = arith.constant 1.000000e+00 : f32
    %66 = vector.broadcast %cst_29 : f32 to vector<16x64xf32>
    %67 = arith.addf %66, %65 : vector<16x64xf32>
    %68 = arith.mulf %29, %67 : vector<16x64xf32>
    %c0_30 = arith.constant 0 : index
    %c0_31 = arith.constant 0 : index
    %69 = vector.load %arg6[%c0_30, %c0_31] : memref<64x32xf32, #tpu.memory_space<vmem>>, vector<64x32xf32>
    %cst_32 = arith.constant dense<0.000000e+00> : vector<16x32xf32>
    %70 = tpu.matmul %68, %69, %cst_32 {dimension_numbers = #tpu.dot_dimension_numbers<[1], [0], [0], [1], [0, 0, 1, 1], [], []>} : vector<16x64xf32>, vector<64x32xf32>, vector<16x32xf32> -> vector<16x32xf32>
    %c0_33 = arith.constant 0 : index
    %c0_34 = arith.constant 0 : index
    %71 = vector.load %arg7[%c0_33, %c0_34] : memref<1x32xf32, #tpu.memory_space<vmem>>, vector<1x32xf32>
    %72 = vector.broadcast %71 : vector<1x32xf32> to vector<16x32xf32>
    %73 = arith.addf %70, %72 : vector<16x32xf32>
    %74 = arith.addf %0, %73 : vector<16x32xf32>
    %c0_35 = arith.constant 0 : index
    %c0_36 = arith.constant 0 : index
    %75 = vector.load %arg8[%c0_35, %c0_36] : memref<16x32xf32, #tpu.memory_space<vmem>>, vector<16x32xf32>
    tpu.vector_store %arg8[%c0_35, %c0_36], %74 {strides = array<i32>} : memref<16x32xf32, #tpu.memory_space<vmem>>, vector<16x32xf32>,
    return
  }
  func.func @transform_0(%arg0: i32) -> (i32, i32) {
    %c0_i32 = arith.constant 0 : i32
    %c0_i32_0 = arith.constant 0 : i32
    return %arg0, %c0_i32 : i32, i32
  }
  func.func @transform_1(%arg0: i32) -> (i32, i32) {
    %c0_i32 = arith.constant 0 : i32
    %c0_i32_0 = arith.constant 0 : i32
    %c0_i32_1 = arith.constant 0 : i32
    return %c0_i32, %c0_i32_0 : i32, i32
  }
  func.func @transform_2(%arg0: i32) -> (i32, i32) {
    %c0_i32 = arith.constant 0 : i32
    %c0_i32_0 = arith.constant 0 : i32
    %c0_i32_1 = arith.constant 0 : i32
    return %c0_i32, %c0_i32_0 : i32, i32
  }
  func.func @transform_3(%arg0: i32) -> (i32, i32) {
    %c0_i32 = arith.constant 0 : i32
    %c0_i32_0 = arith.constant 0 : i32
    %c0_i32_1 = arith.constant 0 : i32
    return %c0_i32, %c0_i32_0 : i32, i32
  }
  func.func @transform_4(%arg0: i32) -> (i32, i32) {
    %c0_i32 = arith.constant 0 : i32
    %c0_i32_0 = arith.constant 0 : i32
    %c0_i32_1 = arith.constant 0 : i32
    return %c0_i32, %c0_i32_0 : i32, i32
  }
  func.func @transform_5(%arg0: i32) -> (i32, i32) {
    %c0_i32 = arith.constant 0 : i32
    %c0_i32_0 = arith.constant 0 : i32
    %c0_i32_1 = arith.constant 0 : i32
    return %c0_i32, %c0_i32_0 : i32, i32
  }
  func.func @transform_6(%arg0: i32) -> (i32, i32) {
    %c0_i32 = arith.constant 0 : i32
    %c0_i32_0 = arith.constant 0 : i32
    %c0_i32_1 = arith.constant 0 : i32
    return %c0_i32, %c0_i32_0 : i32, i32
  }
  func.func @transform_7(%arg0: i32) -> (i32, i32) {
    %c0_i32 = arith.constant 0 : i32
    %c0_i32_0 = arith.constant 0 : i32
    return %arg0, %c0_i32 : i32, i32
  }
}

</mosaic_0001>

<bundles_post_ra>
// kernel: transformer_forward.8
= control target key start
LH: loop header
LB: loop body
LE: loop exit
PB: predicated region body
PF: predicated region fallthrough
CT: control target
= control target key end

     0   :  { %vm21_vm0 = vcmask 261120   ;;  %vm150_vm1 = vcmask 785408   ;;  %s243_s0 = inlined_call_operand.vmem [shape: f32[16,32], index: 0, kind: input, shape index: {}]   ;;  %s244_s3 = inlined_call_operand.vmem [shape: f32[32,96], index: 3, kind: input, shape index: {}]   ;;  %s245_s1 = inlined_call_operand.vmem [shape: f32[1,32], index: 1, kind: input, shape index: {}]   ;;  %s246_s2 = inlined_call_operand.vmem [shape: f32[1,32], index: 2, kind: input, shape index: {}]   ;;  %s247_s4 = inlined_call_operand.vmem [shape: f32[16,96], index: 4, kind: output, shape index: {}]  }
   0x1   :  { %v17_v0 = vld [vmem:[%s243_s0] sm:$0xff]  ;;  %v18_v1 = vld [vmem:[%s243_s0 + $0x8] sm:$0xff]  ;;  %v68_v14 = vld [vmem:[%s244_s3 + $0x18] sm:$0xff] }
   0x2   :  { %v22_v2 = vsel %vm21_vm0, %v17_v0, 0.0  ;;  %v25_v3 = vsel %vm21_vm0, %v18_v1, 0.0  ;;  %v67_v15 = vld [vmem:[%s244_s3 + $0x10] sm:$0xff]  ;;  %167 = vmatprep.subr.mxu0 %v68_v14  ;;  %v66_v16 = vld [vmem:[%s244_s3 + $0x8] sm:$0xff]  ;;  %v65_v17 = vld [vmem:[%s244_s3] sm:$0xff] }
   0x3   :  { %23 = vadd.xlane.f32.xlu0 %v22_v2  ;;  %168 = vmatpush3.msra.mxu0 %v68_v14  ;;  %v157_v25 = vld [vmem:[%s245_s1] ss:$0 sm:$0xff] }
   0x4   :  { %169 = vmatprep.subr.mxu0 %v67_v15  ;;  %v158_v27 = vld [vmem:[%s246_s2] ss:$0 sm:$0xff] }
   0x5   :  { %170 = vmatpush3.msra.mxu0 %v67_v15 }
   0x6   :  { %171 = vmatprep.subr.mxu0 %v66_v16 }
   0x7   :  { %26 = vadd.xlane.f32.xlu0 %v25_v3  ;;  %172 = vmatpush3.msra.mxu0 %v66_v16 }
   0x8   :  { %173 = vmatprep.subr.mxu0 %v65_v17 }
   0x9   :  { %174 = vmatpush3.msra.mxu0 %v65_v17 }
  0x8c   :  { %v24_v4 = vpop.xlane.xlu0 %23 }
  0x8d   :  { %v29_v5 = vmul.f32 0.03125, %v24_v4 }
  0x8f   :  { %v31_v6 = vsub.f32 %v17_v0, %v29_v5 }
  0x90   :  { %v27_v7 = vpop.xlane.xlu0 %26 }
  0x91   :  { %v30_v8 = vmul.f32 0.03125, %v27_v7  ;;  %v33_v9 = vmul.f32 %v31_v6, %v31_v6 }
  0x93   :  { %v32_v10 = vsub.f32 %v18_v1, %v30_v8  ;;  %v35_v11 = vsel %vm21_vm0, %v33_v9, 0.0 }
  0x94   :  { %36 = vadd.xlane.f32.xlu1 %v35_v11 }
  0x95   :  { %v34_v12 = vmul.f32 %v32_v10, %v32_v10 }
  0x97   :  { %v38_v13 = vsel %vm21_vm0, %v34_v12, 0.0 }
  0x98   :  { %39 = vadd.xlane.f32.xlu1 %v38_v13 }
 0x11d   :  { %v37_v18 = vpop.xlane.xlu1 %36 }
 0x11e   :  { %v41_v19 = vmul.f32 0.03125, %v37_v18 }
 0x120   :  { %v43_v20 = vadd.f32 1e-05, %v41_v19 }
 0x121   :  { %v40_v21 = vpop.xlane.xlu1 %39 }
 0x122   :  { %178 = vrsqrt.f32 %v43_v20  ;;  %v42_v22 = vmul.f32 0.03125, %v40_v21 }
 0x124   :  { %v44_v23 = vadd.f32 1e-05, %v42_v22 }
 0x126   :  { %180 = vrsqrt.f32 %v44_v23 }
 0x12f   :  { %v179_v24 = vpop.eup %178 }
 0x130   :  { %v47_v26 = vmul.f32 %v179_v24, %v31_v6 }
 0x132   :  { %v55_v28 = vmul.f32 %v157_v25, %v47_v26 }
 0x133   :  { %v181_v29 = vpop.eup %180 }
 0x134   :  { %v48_v30 = vmul.f32 %v181_v29, %v32_v10  ;;  %v63_v31 = vadd.f32 %v158_v27, %v55_v28 }
 0x136   :  { %v56_v32 = vmul.f32 %v157_v25, %v48_v30  ;;  %175 = vmatprep.mubr.msk.f32.mxu0 %vm21_vm0, %v63_v31 }
 0x138   :  { %v64_v33 = vadd.f32 %v158_v27, %v56_v32 }
 0x13a   :  { %176 = vmatmul.mubr.msk.f32.vlgmr.msra.gmra.mxu0 %vm21_vm0, %v64_v33 }
 0x1fa   :  { %v177_v34 = vpop.f32.mrf.mxu0 }
 0x1fb   :  { %152 = vst.msk [vmem:[%s247_s4 + $0x8] sm:$0xff] %vm150_vm1, %v177_v34 }
 0x1fc   :  { %v141_v35 = vpop.f32.mrf.mxu0 }
 0x1fd   :  { %151 = vst.msk [vmem:[%s247_s4] sm:$0xff] %vm150_vm1, %v141_v35 }

// kernel: transformer_forward.10
= control target key start
LH: loop header
LB: loop body
LE: loop exit
PB: predicated region body
PF: predicated region fallthrough
CT: control target
= control target key end

     0   :  { %vm30_vm0 = vcmask 261120   ;;  %s204_s1 = inlined_call_operand.vmem [shape: f32[32,32], index: 1, kind: input, shape index: {}]   ;;  %s205_s0 = inlined_call_operand.vmem [shape: f32[16,32], index: 0, kind: input, shape index: {}]   ;;  %s206_s2 = inlined_call_operand.vmem [shape: f32[1,32], index: 2, kind: input, shape index: {}]   ;;  %s207_s3 = inlined_call_operand.vmem [shape: f32[16,32], index: 3, kind: input, shape index: {}, may-alias: {3,4}]   ;;  %s208_s4 = inlined_call_operand.vmem [shape: f32[16,32], index: 4, kind: output, shape index: {}, may-alias: {3,4}]  }
   0x1   :  { %v22_v0 = vld [vmem:[%s204_s1 + $0x18] sm:$0xff]  ;;  %v21_v1 = vld [vmem:[%s204_s1 + $0x10] sm:$0xff]  ;;  %v17_v2 = vld [vmem:[%s205_s0] sm:$0xff] }
   0x2   :  { %131 = vmatprep.subr.mxu0 %v22_v0  ;;  %v20_v3 = vld [vmem:[%s204_s1 + $0x8] sm:$0xff]  ;;  %139 = vmatprep.mubr.msk.f32.mxu0 %vm30_vm0, %v17_v2  ;;  %v19_v4 = vld [vmem:[%s204_s1] sm:$0xff] }
   0x3   :  { %132 = vmatpush3.msra.mxu0 %v22_v0  ;;  %v18_v5 = vld [vmem:[%s205_s0 + $0x8] sm:$0xff]  ;;  %v122_v6 = vld [vmem:[%s206_s2] ss:$0 sm:$0xff] }
   0x4   :  { %133 = vmatprep.subr.mxu0 %v21_v1  ;;  %v113_v8 = vld [vmem:[%s207_s3 + $0x8] sm:$0xff]  ;;  %v112_v11 = vld [vmem:[%s207_s3] sm:$0xff] }
   0x5   :  { %134 = vmatpush3.msra.mxu0 %v21_v1 }
   0x6   :  { %135 = vmatprep.subr.mxu0 %v20_v3 }
   0x7   :  { %136 = vmatpush3.msra.mxu0 %v20_v3 }
   0x8   :  { %137 = vmatprep.subr.mxu0 %v19_v4 }
   0x9   :  { %138 = vmatpush3.msra.mxu0 %v19_v4 }
   0xa   :  { %140 = vmatmul.mubr.msk.f32.vlgmr.msra.gmra.mxu0 %vm30_vm0, %v18_v5 }
  0xca   :  { %v141_v7 = vpop.f32.mrf.mxu0 }
  0xcb   :  { %v109_v9 = vadd.f32 %v141_v7, %v122_v6 }
  0xcc   :  { %v103_v10 = vpop.f32.mrf.mxu0 }
  0xcd   :  { %v115_v12 = vadd.f32 %v113_v8, %v109_v9  ;;  %v104_v13 = vadd.f32 %v122_v6, %v103_v10 }
  0xcf   :  { %117 = vst.msk [vmem:[%s208_s4 + $0x8] sm:$0xff] %vm30_vm0, %v115_v12  ;;  %v114_v14 = vadd.f32 %v112_v11, %v104_v13 }
  0xd1   :  { %116 = vst.msk [vmem:[%s208_s4] sm:$0xff] %vm30_vm0, %v114_v14 }

// kernel: transformer_forward.9
= control target key start
LH: loop header
LB: loop body
LE: loop exit
PB: predicated region body
PF: predicated region fallthrough
CT: control target
= control target key end

     0   :  { %s692_s12 = smov 0   ;;  %s694_s13 = smov 0   ;;  %s761_s0 = inlined_call_operand.vmem [shape: f32[2,4,8,8], index: 0, kind: input, shape index: {}]   ;;  %s762_s1 = inlined_call_operand.vmem [shape: f32[2,4,8,8], index: 1, kind: input, shape index: {}]   ;;  %s763_s2 = inlined_call_operand.vmem [shape: f32[2,4,8,8], index: 2, kind: input, shape index: {}]   ;;  %s764_s3 = inlined_call_operand.vmem [shape: f32[2,4,8,8], index: 3, kind: output, shape index: {}]  }
   0x1   :  { %s696_s14 = smov 0   ;;  %s698_s15 = smov 0  }
   0x2   :  { %s700_s16 = smov 0  }
   0x3 LB: > { %s22_s17 = sadd.s32 1, %s660_s14  ;;  %s25_s18 = sadd.s32 1, %s664_s15  ;;  %s668_s16 = sphi %s700_s16, %s13_s16   ;;  %s664_s15 = sphi %s698_s15, %s768_s15   ;;  %s660_s14 = sphi %s696_s14, %s767_s14   ;;  %s656_s13 = sphi %s694_s13, %s766_s13   ;;  %s652_s12 = sphi %s692_s12, %s765_s12  }
   0x4   : > { %p23_p0 = scmp.ge.s32.totalorder %s22_s17, 4  ;;  %p556_p1 = scmp.ge.s32.totalorder %s668_s16, 1 }
   0x5   : > { %p186_p2 = scmp.lt.s32.totalorder %s668_s16, 9 }
   0x6   : > { %s770_s17 = smov (%p23_p0, %s22_s17), 0  ;;  %s772_s18 = smov (!%p23_p0, %s25_s18), %s664_s15 }
   0x7   : > { %p187_p3 = pnand %p556_p1, %p186_p2  ;;  %p27_p4 = scmp.ge.s32.totalorder %s772_s18, 2 }
   0x8   : > { %p232_p5 = scmp.lt.s32.totalorder (!%p187_p3), %s656_s13, 1  ;;  %p234_p6 = scmp.lt.s32.totalorder (!%p187_p3), %s652_s12, 3 }
   0x9   : > { %s774_s18 = smov (%p27_p4, %s772_s18), 0  ;;  %190 = sbr.rel (%p187_p3) target bundleno = 725 (0x2d5), region = 32 }
   0xe   : > { %v670_v0 = vmov 0.0   ;;  %vm671_vm0 = vmmov 0   ;;  %s776_s13 = smov (!%p232_p5, %s656_s13), 1  ;;  %s778_s12 = smov (!%p234_p6, %s652_s12), 3  ;;  %vm267_vm1 = vcmask 64512  }
   0xf   : > { %574 = vmatprep.subr.mxu0 %v670_v0  ;;  %576 = vmatprep.mubr.msk.f32.mxu0 %vm671_vm0, %v670_v0  ;;  %s557_s19 = sshll.u32 %s776_s13, 2 }
  0x10   : > { %579 = vmatprep.subr.mxu1 %v670_v0  ;;  %581 = vmatprep.mubr.msk.f32.mxu1 %vm671_vm0, %v670_v0  ;;  %s237_s20 = sadd.s32 %s557_s19, %s778_s12 }
  0x11   : > { %s722_s21 = sshll.u32 %s237_s20, 3 }
  0x12   : > { %s247_s24 = scalar_lea.vmem %s762_s1, %s722_s21  ;;  %s239_s27 = scalar_lea.vmem %s761_s0, %s722_s21 }
  0x13   : > { %v265_v1 = vld [vmem:[%s247_s24] sm:$0xff]  ;;  %s255_s30 = scalar_lea.vmem %s763_s2, %s722_s21  ;;  %s263_s6 = scalar_lea.vmem %s764_s3, %s722_s21 }
  0x14   : > { %575 = vmatpush3.xpose.msk.msra.mxu0 %vm267_vm1, %v265_v1  ;;  %v264_v2 = vld [vmem:[%s239_s27] sm:$0xff] }
  0x15   : > { %v266_v12 = vld [vmem:[%s255_s30] sm:$0xff] }
  0x16   : > { %580 = vmatpush3.msra.mxu1 %v266_v12 }
  0x17   : > { %577 = vmatmul.mubr.msk.f32.vlgmr.msra.gmra.mxu0 %vm267_vm1, %v264_v2 }
  0xd7   : > { %v340_v3 = vpop.f32.mrf.mxu0 }
  0xd8   : > { %v344_v4 = vmul.f32 0.17677669, %v340_v3 }
  0xd9   : > { %v578_v5 = vpop.f32.mrf.mxu0 }
  0xda   : > { %v345_v6 = vsel %vm267_vm1, %v344_v4, -inf }
  0xdb   : > { %346 = vmax.xlane.f32.xlu0 %v345_v6 }
 0x164   : > { %v347_v7 = vpop.xlane.xlu0 %346 }
 0x165   : > { %v348_v8 = vsub.f32 %v344_v4, %v347_v7 }
 0x167   : > { %v349_v9 = vmul.f32 1.442695, %v348_v8 }
 0x169   : > { %626 = vpow2.f32 %v349_v9 }
 0x176   : > { %v627_v10 = vpop.eup %626 }
 0x177   : > { %v351_v11 = vsel %vm267_vm1, %v627_v10, 0.0 }
 0x178   : > { %352 = vadd.xlane.f32.xlu0 %v351_v11 }
 0x201   : > { %v353_v13 = vpop.xlane.xlu0 %352 }
 0x202   : > { %628 = vrcp.f32 %v353_v13 }
 0x20f   : > { %v629_v14 = vpop.eup %628 }
 0x210   : > { %v355_v15 = vmul.f32 %v629_v14, %v627_v10 }
 0x212   : > { %582 = vmatmul.mubr.msk.f32.vlgmr.msra.gmra.mxu1 %vm267_vm1, %v355_v15 }
 0x2d2   : > { %v425_v16 = vpop.f32.mrf.mxu1 }
 0x2d3   : > { %429 = vst.msk [vmem:[%s263_s6] sm:$0xff] %vm267_vm1, %v425_v16 }
 0x2d4   : > { %v583_v17 = vpop.f32.mrf.mxu1 }
 0x2d5 PF: > { %s13_s16 = sadd.s32 1, %s668_s16   ;;  %s765_s12 = smov %s660_s14 }
 0x2d6   : > { %p10_p7 = scmp.ge.s32.totalorder %s13_s16, 10   ;;  %s766_s13 = smov %s664_s15 }
 0x2d7   : > { %s767_s14 = smov %s770_s17  ;;  %s768_s15 = smov %s774_s18 }
 0x2d8   :  { %12 = sbr.rel (!%p10_p7) target bundleno = 3 (0x3), region = 68 }

// kernel: transformer_forward.11
= control target key start
LH: loop header
LB: loop body
LE: loop exit
PB: predicated region body
PF: predicated region fallthrough
CT: control target
= control target key end

     0   :  { %vm30_vm0 = vcmask 261120   ;;  %vm235_vm3 = vcmask 523264   ;;  %s511_s0 = inlined_call_operand.vmem [shape: f32[16,32], index: 0, kind: input, shape index: {}, may-alias: {0,7}]   ;;  %s512_s3 = inlined_call_operand.vmem [shape: f32[32,64], index: 3, kind: input, shape index: {}]   ;;  %s513_s1 = inlined_call_operand.vmem [shape: f32[1,32], index: 1, kind: input, shape index: {}]   ;;  %s514_s2 = inlined_call_operand.vmem [shape: f32[1,32], index: 2, kind: input, shape index: {}]   ;;  %s515_s5 = inlined_call_operand.vmem [shape: f32[64,32], index: 5, kind: input, shape index: {}]   ;;  %s516_s4 = inlined_call_operand.vmem [shape: f32[1,64], index: 4, kind: input, shape index: {}]   ;;  %s517_s6 = inlined_call_operand.vmem [shape: f32[1,32], index: 6, kind: input, shape index: {}]   ;;  %s518_s7 = inlined_call_operand.vmem [shape: f32[16,32], index: 7, kind: output, shape index: {}, may-alias: {0,7}]  }
   0x1   :  { %v436_v0 = vld [vmem:[%s511_s0] sm:$0xff]  ;;  %v441_v1 = vld [vmem:[%s511_s0 + $0x8] sm:$0xff]  ;;  %v77_v14 = vld [vmem:[%s512_s3 + $0x18] sm:$0xff] }
   0x2   :  { %v31_v2 = vsel %vm30_vm0, %v436_v0, 0.0  ;;  %v34_v3 = vsel %vm30_vm0, %v441_v1, 0.0  ;;  %v76_v15 = vld [vmem:[%s512_s3 + $0x10] sm:$0xff]  ;;  %349 = vmatprep.subr.mxu0 %v77_v14  ;;  %v75_v16 = vld [vmem:[%s512_s3 + $0x8] sm:$0xff]  ;;  %v74_v17 = vld [vmem:[%s512_s3] sm:$0xff] }
   0x3   :  { %32 = vadd.xlane.f32.xlu0 %v31_v2  ;;  %350 = vmatpush3.msra.mxu0 %v77_v14  ;;  %v325_v25 = vld [vmem:[%s513_s1] ss:$0 sm:$0xff]  ;;  %v227_v34 = vld [vmem:[%s515_s5 + $0x38] sm:$0xff]  ;;  %v226_v35 = vld [vmem:[%s515_s5 + $0x30] sm:$0xff] }
   0x4   :  { %351 = vmatprep.subr.mxu0 %v76_v15  ;;  %v326_v27 = vld [vmem:[%s514_s2] ss:$0 sm:$0xff]  ;;  %360 = vmatprep.subr.mxu1 %v227_v34  ;;  %v225_v36 = vld [vmem:[%s515_s5 + $0x28] sm:$0xff]  ;;  %v223_v38 = vld [vmem:[%s515_s5 + $0x18] sm:$0xff] }
   0x5   :  { %352 = vmatpush3.msra.mxu0 %v76_v15  ;;  %361 = vmatpush3.msra.mxu1 %v227_v34  ;;  %v224_v37 = vld [vmem:[%s515_s5 + $0x20] sm:$0xff]  ;;  %v222_v39 = vld [vmem:[%s515_s5 + $0x10] sm:$0xff]  ;;  %v221_v40 = vld [vmem:[%s515_s5 + $0x8] sm:$0xff] }
   0x6   :  { %353 = vmatprep.subr.mxu0 %v75_v16  ;;  %362 = vmatprep.subr.mxu1 %v226_v35  ;;  %v220_v41 = vld [vmem:[%s515_s5] sm:$0xff] }
   0x7   :  { %35 = vadd.xlane.f32.xlu0 %v34_v3  ;;  %354 = vmatpush3.msra.mxu0 %v75_v16  ;;  %v327_v42 = vld [vmem:[%s516_s4] ss:$0 sm:$0xff] }
   0x8   :  { %355 = vmatprep.subr.mxu0 %v74_v17  ;;  %363 = vmatpush3.msra.mxu1 %v226_v35 }
   0x9   :  { %356 = vmatpush3.msra.mxu0 %v74_v17  ;;  %364 = vmatprep.subr.mxu1 %v225_v36 }
   0xa   :  { %365 = vmatpush3.msra.mxu1 %v225_v36  ;;  %v330_v36 = vld [vmem:[%s517_s6] ss:$0 sm:$0xff] }
   0xb   :  { %366 = vmatprep.subr.mxu1 %v224_v37 }
   0xc   :  { %367 = vmatpush3.msra.mxu1 %v224_v37 }
   0xd   :  { %368 = vmatprep.subr.mxu1 %v223_v38 }
   0xe   :  { %369 = vmatpush3.msra.mxu1 %v223_v38 }
   0xf   :  { %370 = vmatprep.subr.mxu1 %v222_v39 }
  0x10   :  { %371 = vmatpush3.msra.mxu1 %v222_v39 }
  0x11   :  { %372 = vmatprep.subr.mxu1 %v221_v40 }
  0x12   :  { %373 = vmatpush3.msra.mxu1 %v221_v40 }
  0x13   :  { %374 = vmatprep.subr.mxu1 %v220_v41 }
  0x14   :  { %375 = vmatpush3.msra.mxu1 %v220_v41 }
  0x8c   :  { %v33_v4 = vpop.xlane.xlu0 %32 }
  0x8d   :  { %v38_v5 = vmul.f32 0.03125, %v33_v4 }
  0x8f   :  { %v40_v6 = vsub.f32 %v436_v0, %v38_v5 }
  0x90   :  { %v36_v7 = vpop.xlane.xlu0 %35 }
  0x91   :  { %v39_v8 = vmul.f32 0.03125, %v36_v7  ;;  %v42_v9 = vmul.f32 %v40_v6, %v40_v6 }
  0x93   :  { %v41_v10 = vsub.f32 %v441_v1, %v39_v8  ;;  %v44_v11 = vsel %vm30_vm0, %v42_v9, 0.0 }
  0x94   :  { %45 = vadd.xlane.f32.xlu1 %v44_v11 }
  0x95   :  { %v43_v12 = vmul.f32 %v41_v10, %v41_v10 }
  0x97   :  { %v47_v13 = vsel %vm30_vm0, %v43_v12, 0.0 }
  0x98   :  { %48 = vadd.xlane.f32.xlu1 %v47_v13 }
 0x11d   :  { %v46_v18 = vpop.xlane.xlu1 %45 }
 0x11e   :  { %v50_v19 = vmul.f32 0.03125, %v46_v18 }
 0x120   :  { %v52_v20 = vadd.f32 1e-05, %v50_v19 }
 0x121   :  { %v49_v21 = vpop.xlane.xlu1 %48 }
 0x122   :  { %380 = vrsqrt.f32 %v52_v20  ;;  %v51_v22 = vmul.f32 0.03125, %v49_v21 }
 0x124   :  { %v53_v23 = vadd.f32 1e-05, %v51_v22 }
 0x126   :  { %382 = vrsqrt.f32 %v53_v23  ;;  %v392_v23 = vmov -1.0  }
 0x12f   :  { %v381_v24 = vpop.eup %380 }
 0x130   :  { %v56_v26 = vmul.f32 %v381_v24, %v40_v6 }
 0x132   :  { %v64_v28 = vmul.f32 %v325_v25, %v56_v26 }
 0x133   :  { %v383_v29 = vpop.eup %382 }
 0x134   :  { %v57_v30 = vmul.f32 %v383_v29, %v41_v10  ;;  %v72_v31 = vadd.f32 %v326_v27, %v64_v28 }
 0x136   :  { %v65_v32 = vmul.f32 %v325_v25, %v57_v30  ;;  %357 = vmatprep.mubr.msk.f32.mxu0 %vm30_vm0, %v72_v31 }
 0x138   :  { %v73_v33 = vadd.f32 %v326_v27, %v65_v32 }
 0x13a   :  { %358 = vmatmul.mubr.msk.f32.vlgmr.msra.gmra.mxu0 %vm30_vm0, %v73_v33 }
 0x1fa   :  { %v359_v43 = vpop.f32.mrf.mxu0 }
 0x1fb   :  { %v163_v44 = vadd.f32 %v359_v43, %v327_v42 }
 0x1fc   :  { %v157_v45 = vpop.f32.mrf.mxu0 }
 0x1fd   :  { %v169_v46 = vmul.f32 0.70710677, %v163_v44  ;;  %v158_v47 = vadd.f32 %v327_v42, %v157_v45  ;;  %v167_v33 = vmul.f32 0.5, %v163_v44 }
 0x1ff   :  { %v175_v48 = vand.u32 2147483647, %v169_v46  ;;  %v168_v49 = vmul.f32 0.70710677, %v158_v47  ;;  %vm171_vm1 = vcmp.ge.f32.partialorder %v169_v46, 0.0  ;;  %v166_v31 = vmul.f32 0.5, %v158_v47 }
 0x200   :  { %v173_v24 = vsel %vm171_vm1, 1.0, %v392_v23 }
 0x201   :  { %v177_v50 = vmul.f32 0.3275911, %v175_v48  ;;  %v174_v51 = vand.u32 2147483647, %v168_v49  ;;  %v203_v55 = vsub.f32 0.0, %v175_v48  ;;  %vm170_vm2 = vcmp.ge.f32.partialorder %v168_v49, 0.0 }
 0x202   :  { %v172_v28 = vsel %vm170_vm2, 1.0, %v392_v23 }
 0x203   :  { %v179_v52 = vadd.f32 1.0, %v177_v50  ;;  %v176_v53 = vmul.f32 0.3275911, %v174_v51  ;;  %v202_v56 = vsub.f32 0.0, %v174_v51  ;;  %v205_v57 = vmul.f32 %v203_v55, %v175_v48 }
 0x205   :  { %384 = vrcp.f32 %v179_v52  ;;  %v178_v54 = vadd.f32 1.0, %v176_v53  ;;  %v204_v59 = vmul.f32 %v202_v56, %v174_v51  ;;  %v208_v61 = vmul.f32 1.442695, %v205_v57 }
 0x207   :  { %386 = vrcp.f32 %v178_v54  ;;  %v206_v2 = vmul.f32 1.442695, %v204_v59 }
 0x208   :  { %388 = vpow2.f32 %v208_v61 }
 0x209   :  { %390 = vpow2.f32 %v206_v2 }
 0x212   :  { %v385_v58 = vpop.eup %384 }
 0x213   :  { %v185_v60 = vmul.f32 1.0614054, %v385_v58 }
 0x214   :  { %v387_v62 = vpop.eup %386 }
 0x215   :  { %v187_v63 = vadd.f32 -1.4531521, %v185_v60  ;;  %v184_v3 = vmul.f32 1.0614054, %v387_v62  ;;  %v389_v17 = vpop.eup %388 }
 0x216   :  { %v391_v21 = vpop.eup %390 }
 0x217   :  { %v189_v4 = vmul.f32 %v385_v58, %v187_v63  ;;  %v186_v5 = vadd.f32 -1.4531521, %v184_v3 }
 0x219   :  { %v191_v6 = vadd.f32 1.4214138, %v189_v4  ;;  %v188_v7 = vmul.f32 %v387_v62, %v186_v5 }
 0x21b   :  { %v193_v8 = vmul.f32 %v385_v58, %v191_v6  ;;  %v190_v9 = vadd.f32 1.4214138, %v188_v7 }
 0x21d   :  { %v195_v10 = vadd.f32 -0.28449672, %v193_v8  ;;  %v192_v11 = vmul.f32 %v387_v62, %v190_v9 }
 0x21f   :  { %v197_v12 = vmul.f32 %v385_v58, %v195_v10  ;;  %v194_v13 = vadd.f32 -0.28449672, %v192_v11 }
 0x221   :  { %v199_v14 = vadd.f32 0.2548296, %v197_v12  ;;  %v196_v15 = vmul.f32 %v387_v62, %v194_v13 }
 0x223   :  { %v201_v16 = vmul.f32 %v385_v58, %v199_v14  ;;  %v198_v18 = vadd.f32 0.2548296, %v196_v15 }
 0x225   :  { %v211_v19 = vmul.f32 %v389_v17, %v201_v16  ;;  %v200_v20 = vmul.f32 %v387_v62, %v198_v18 }
 0x227   :  { %v213_v22 = vsub.f32 1.0, %v211_v19  ;;  %v210_v25 = vmul.f32 %v391_v21, %v200_v20 }
 0x229   :  { %v215_v26 = vmul.f32 %v213_v22, %v173_v24  ;;  %v212_v27 = vsub.f32 1.0, %v210_v25 }
 0x22b   :  { %v214_v29 = vmul.f32 %v212_v27, %v172_v28  ;;  %v217_v30 = vadd.f32 1.0, %v215_v26 }
 0x22d   :  { %v216_v32 = vadd.f32 1.0, %v214_v29  ;;  %v219_v35 = vmul.f32 %v217_v30, %v167_v33 }
 0x22f   :  { %v218_v34 = vmul.f32 %v216_v32, %v166_v31 }
 0x231   :  { %376 = vmatprep.mubr.msk.f32.mxu1 %vm235_vm3, %v218_v34 }
 0x232   :  { %377 = vmatmul.mubr.msk.f32.vlgmr.msra.gmra.mxu1 %vm235_vm3, %v219_v35 }
 0x2f2   :  { %v378_v37 = vpop.f32.mrf.mxu1 }
 0x2f3   :  { %v314_v38 = vadd.f32 %v378_v37, %v330_v36 }
 0x2f4   :  { %v308_v39 = vpop.f32.mrf.mxu1 }
 0x2f5   :  { %v318_v40 = vadd.f32 %v314_v38, %v441_v1  ;;  %v309_v41 = vadd.f32 %v330_v36, %v308_v39 }
 0x2f7   :  { %320 = vst.msk [vmem:[%s518_s7 + $0x8] sm:$0xff] %vm30_vm0, %v318_v40  ;;  %v317_v42 = vadd.f32 %v309_v41, %v436_v0 }
 0x2f9   :  { %319 = vst.msk [vmem:[%s518_s7] sm:$0xff] %vm30_vm0, %v317_v42 }

</bundles_post_ra>
